<compile_context>
chip_gen: v7x
topology: tpu7x:2x2x1
jax: 0.10.0
libtpu: 0.0.40
codegen_flags: <defaults>
</compile_context>

<pallas_src>
import functools
import math
from typing import NamedTuple

import jax
import jax.numpy as jnp
from jax.experimental import pallas as pl
from jax.experimental.pallas import tpu as pltpu

_MIB = 1024 * 1024


def _round_up(x: int, m: int) -> int:
    return (x + m - 1) // m * m


def _cdiv(a: int, b: int) -> int:
    return -(-a // b)


@functools.lru_cache(maxsize=1)
def _vmem_capacity_bytes() -> int:
    """Physical per-core VMEM capacity (falls back to 128 MiB)."""
    try:
        info = pltpu.get_tpu_info()
        cap = int(getattr(info, "vmem_capacity_bytes", 0))
        if cap > 0:
            return cap
    except Exception:
        pass
    return 128 * _MIB


class _FFNDims(NamedTuple):
    d_model_p: int
    d_ff_p: int
    t_ff: int
    w_itemsize: int
    vmem_limit: int
    small_vmem: bool


@functools.lru_cache(maxsize=None)
def _ffn_dims(d_model: int, d_ff: int, w_itemsize: int) -> _FFNDims:
    """Padded feature dims + d_ff chunk size, chosen per TPU generation."""
    vmem_cap = _vmem_capacity_bytes()
    small_vmem = vmem_cap <= 64 * _MIB          # v7x-like: 64 MiB/TC, 2 TCs
    if small_vmem:
        vmem_limit = max(32 * _MIB, min(vmem_cap - 12 * _MIB, 52 * _MIB))
    else:                                       # v5e / v6e: 128 MiB physical
        vmem_limit = min(vmem_cap - 24 * _MIB, 100 * _MIB)

    d_model_p = _round_up(d_model, 128)
    d_ff_base = _round_up(d_ff, 128)

    # d_ff chunk target: smaller on v7x with very wide models (weight chunks
    # alone would otherwise eat the 64 MiB budget).
    t_ff_max = 512 if (small_vmem and d_model_p >= 4096) else 1024

    nk = max(1, _cdiv(d_ff_base, t_ff_max))
    if nk == 1 and d_ff_base >= 256:
        nk = 2                                  # >=2 k-steps so weight DMA pipelines

    def mk(nk_):
        t = _round_up(_cdiv(d_ff_base, nk_), 128)
        return t, t * nk_

    t_ff, d_ff_p = mk(nk)
    # Keep double-buffered W1+W2 chunks within ~half the VMEM budget.
    while t_ff > 128 and 4 * d_model_p * t_ff * w_itemsize > vmem_limit // 2:
        nk += 1
        t_ff, d_ff_p = mk(nk)

    return _FFNDims(d_model_p, d_ff_p, t_ff, w_itemsize, vmem_limit, small_vmem)


def _pick_tm(M: int, cfg: _FFNDims, compute_itemsize: int, out_itemsize: int,
             use_scratch: bool) -> int:
    """Row tile: as large as VMEM allows (weights are re-streamed per row
    tile, so arithmetic intensity ~ tm); on dual-TC chips keep >=2 row tiles
    so both cores run."""
    tm_max = 512 if cfg.small_vmem else 768
    if cfg.small_vmem and M > 8:
        tm = min(tm_max, _round_up(_cdiv(M, 2), 8))
    else:
        tm = min(tm_max, _round_up(M, 8))

    def est(tm_):
        w = 4 * cfg.d_model_p * cfg.t_ff * cfg.w_itemsize      # W1+W2, 2 buffers
        b = 2 * (cfg.t_ff + cfg.d_model_p) * cfg.w_itemsize    # b1, b2
        xb = 2 * tm_ * cfg.d_model_p * compute_itemsize        # x block, 2 buffers
        ob = 2 * tm_ * cfg.d_model_p * out_itemsize            # out block, 2 buffers
        ac = tm_ * cfg.d_model_p * 4 if use_scratch else 0     # f32 accumulator
        hb = tm_ * cfg.t_ff * 4                                # relu intermediate
        return w + b + xb + ob + ac + hb

    while tm > 8 and est(tm) > cfg.vmem_limit:
        tm = max(8, _round_up(tm // 2, 8))
    return tm


def _ffn_kernel(x_ref, w1_ref, b1_ref, w2_ref, b2_ref, o_ref, acc_ref=None):
    # x_ref : (tm, d_model_p)        block of input rows (compute dtype)
    # w1_ref: (d_model_p, t_ff)      d_ff chunk of W1
    # b1_ref: (1, t_ff)              d_ff chunk of b1
    # w2_ref: (t_ff, d_model_p)      d_ff chunk of W2
    # b2_ref: (1, d_model_p)         full b2
    # o_ref : (tm, d_model_p)        output rows
    # acc_ref: optional (tm, d_model_p) f32 scratch (only for non-f32 output;
    #          f32 output accumulates directly into o_ref).
    acc = o_ref if acc_ref is None else acc_ref
    k = pl.program_id(1)

    # linear_1 chunk: operands in storage dtype, f32 accumulation on the MXU.
    h = jnp.dot(x_ref[...], w1_ref[...], preferred_element_type=jnp.float32)
    h = jnp.maximum(h + b1_ref[...].astype(jnp.float32), 0.0)

    # dropout (eval mode) == identity

    # linear_2 chunk.
    partial = jnp.dot(h.astype(w2_ref.dtype), w2_ref[...],
                      preferred_element_type=jnp.float32)

    @pl.when(k == 0)
    def _():
        acc[...] = partial.astype(acc.dtype)          # write-first (no zero pass)

    @pl.when(k != 0)
    def _():
        acc[...] += partial.astype(acc.dtype)

    @pl.when(k == pl.num_programs(1) - 1)
    def _():
        o_ref[...] = (acc[...].astype(jnp.float32)
                      + b2_ref[...].astype(jnp.float32)).astype(o_ref.dtype)


@functools.partial(jax.jit, static_argnames=("d_ff",))
def _ffn_forward(x, w1p, b1p, w2p, b2p, *, d_ff):
    orig_shape = x.shape
    d_model = orig_shape[-1]
    M = int(math.prod(orig_shape[:-1]))

    compute_dtype = w1p.dtype
    out_dtype = x.dtype
    w_itemsize = jnp.dtype(compute_dtype).itemsize
    out_itemsize = jnp.dtype(out_dtype).itemsize

    cfg = _ffn_dims(d_model, d_ff, w_itemsize)
    d_model_p, d_ff_p, t_ff = cfg.d_model_p, cfg.d_ff_p, cfg.t_ff
    assert w1p.shape == (d_model_p, d_ff_p) and w2p.shape == (d_ff_p, d_model_p)

    use_scratch = jnp.dtype(out_dtype) != jnp.dtype(jnp.float32)
    tm = _pick_tm(M, cfg, w_itemsize, out_itemsize, use_scratch)
    M_p = _round_up(M, tm)

    # Only the activation rows are padded per call (weights are pre-padded).
    x2d = x.reshape(M, d_model).astype(compute_dtype)
    x2d = jnp.pad(x2d, ((0, M_p - M), (0, d_model_p - d_model)))

    grid = (M_p // tm, d_ff_p // t_ff)

    # Weights are re-streamed once per row tile.
    cost = pl.CostEstimate(
        flops=4 * M * d_model * d_ff,
        transcendentals=0,
        bytes_accessed=(M_p * d_model_p * w_itemsize
                        + grid[0] * (w1p.size + w2p.size) * w_itemsize
                        + M_p * d_model_p * out_itemsize),
    )

    scratch_shapes = ([pltpu.VMEM((tm, d_model_p), jnp.float32)]
                      if use_scratch else [])

    out2d = pl.pallas_call(
        _ffn_kernel,
        out_shape=jax.ShapeDtypeStruct((M_p, d_model_p), out_dtype),
        grid_spec=pltpu.PrefetchScalarGridSpec(
            num_scalar_prefetch=0,
            grid=grid,
            in_specs=[
                pl.BlockSpec((tm, d_model_p), lambda i, k: (i, 0)),    # x rows
                pl.BlockSpec((d_model_p, t_ff), lambda i, k: (0, k)),  # W1 chunk
                pl.BlockSpec((1, t_ff), lambda i, k: (0, k)),          # b1 chunk
                pl.BlockSpec((t_ff, d_model_p), lambda i, k: (k, 0)),  # W2 chunk
                pl.BlockSpec((1, d_model_p), lambda i, k: (0, 0)),     # b2
            ],
            out_specs=pl.BlockSpec((tm, d_model_p), lambda i, k: (i, 0)),
            scratch_shapes=scratch_shapes,
        ),
        compiler_params=pltpu.CompilerParams(
            dimension_semantics=("parallel", "arbitrary"),
            vmem_limit_bytes=cfg.vmem_limit,
        ),
        cost_estimate=cost,
    )(x2d, w1p, b1p, w2p, b2p)

    return out2d[:M, :d_model].reshape(orig_shape)


class PallasFeedForward:
    """Eval-mode FeedForwardBlock: y = relu(x @ W1 + b1) @ W2 + b2.

    Weights are stored as (in, out), i.e. transposed vs torch.nn.Linear.weight.
    Padding to 128-aligned dims (and optional cast, e.g. bf16) happens ONCE
    here, not per forward call. Pass param_dtype=jnp.bfloat16 for the fast
    bf16 MXU path on real models.
    """

    def __init__(self, w1, b1, w2, b2, param_dtype=None):
        if param_dtype is not None:
            w1, b1, w2, b2 = (a.astype(param_dtype) for a in (w1, b1, w2, b2))
        self.d_model, self.d_ff = int(w1.shape[0]), int(w1.shape[1])
        cfg = _ffn_dims(self.d_model, self.d_ff, jnp.dtype(w1.dtype).itemsize)
        dmp, dfp = cfg.d_model_p, cfg.d_ff_p
        self.w1p = jnp.pad(w1, ((0, dmp - self.d_model), (0, dfp - self.d_ff)))
        self.b1p = jnp.pad(b1, (0, dfp - self.d_ff)).reshape(1, dfp)
        self.w2p = jnp.pad(w2, ((0, dfp - self.d_ff), (0, dmp - self.d_model)))
        self.b2p = jnp.pad(b2, (0, dmp - self.d_model)).reshape(1, dmp)

    def __call__(self, x):
        return _ffn_forward(x, self.w1p, self.b1p, self.w2p, self.b2p,
                            d_ff=self.d_ff)


def feed_forward_block(x, w1, b1, w2, b2):
    """One-off convenience wrapper (pads weights on every call; prefer
    PallasFeedForward for repeated use)."""
    return PallasFeedForward(w1, b1, w2, b2)(x)


def _reference(x, w1, b1, w2, b2):
    h = jnp.maximum(jnp.einsum("bsd,df->bsf", x, w1) + b1, 0.0)
    return jnp.einsum("bsf,fd->bsd", h, w2) + b2


if __name__ == "__main__":
    # Small, forward-implied shapes: batch=2, seq=8, d_model=32, d_ff=64.
    B, S, d_model, d_ff = 2, 8, 32, 64

    key = jax.random.PRNGKey(0)
    kx, k1, k2, k3, k4 = jax.random.split(key, 5)

    x = jax.random.normal(kx, (B, S, d_model), dtype=jnp.float32)

    # Deterministic parameter init (uniform, ~PyTorch Linear scale).
    bound1 = 1.0 / (d_model ** 0.5)
    bound2 = 1.0 / (d_ff ** 0.5)
    # Stored as (in, out) — transposed relative to PyTorch's (out, in) weight.
    w1 = jax.random.uniform(k1, (d_model, d_ff), jnp.float32, -bound1, bound1)
    b1 = jax.random.uniform(k2, (d_ff,), jnp.float32, -bound1, bound1)
    w2 = jax.random.uniform(k3, (d_ff, d_model), jnp.float32, -bound2, bound2)
    b2 = jax.random.uniform(k4, (d_model,), jnp.float32, -bound2, bound2)

    ffn = PallasFeedForward(w1, b1, w2, b2)        # f32 demo for exact check
    y = ffn(x)
    jax.block_until_ready(y)

    y_ref = _reference(x, w1, b1, w2, b2)
    assert y.shape == (B, S, d_model)
    assert jnp.allclose(y, y_ref, atol=1e-4, rtol=1e-4)

    print("KERNEL_OK")
</pallas_src>

<mosaic_0001>
module attributes {stable_mosaic.version = 11 : i64} {
  func.func @_ffn_kernel(%arg0: i32, %arg1: i32, %arg2: memref<16x128xf32, #tpu.memory_space<vmem>>, %arg3: memref<128x128xf32, #tpu.memory_space<vmem>>, %arg4: memref<1x128xf32, #tpu.memory_space<vmem>>, %arg5: memref<128x128xf32, #tpu.memory_space<vmem>>, %arg6: memref<1x128xf32, #tpu.memory_space<vmem>>, %arg7: memref<16x128xf32, #tpu.memory_space<vmem>>) attributes {dimension_semantics = [#tpu.dimension_semantics<parallel>, #tpu.dimension_semantics<arbitrary>], iteration_bounds = array<i64: 1, 1>, scalar_prefetch = 0 : i64, scratch_operands = 0 : i64, tpu.core_type = #tpu.core_type<tc>, window_params = [{transform_indices = @transform_0, window_bounds = array<i64: 16, 128>}, {transform_indices = @transform_1, window_bounds = array<i64: 128, 128>}, {transform_indices = @transform_2, window_bounds = array<i64: 1, 128>}, {transform_indices = @transform_3, window_bounds = array<i64: 128, 128>}, {pipeline_mode = #tpu.pipeline_mode<synchronous>, transform_indices = @transform_4, window_bounds = array<i64: 1, 128>}, {transform_indices = @transform_5, window_bounds = array<i64: 16, 128>}]} {
    %c0 = arith.constant 0 : index
    %c0_0 = arith.constant 0 : index
    %0 = vector.load %arg2[%c0, %c0_0] : memref<16x128xf32, #tpu.memory_space<vmem>>, vector<16x128xf32>
    %c0_1 = arith.constant 0 : index
    %c0_2 = arith.constant 0 : index
    %1 = vector.load %arg3[%c0_1, %c0_2] : memref<128x128xf32, #tpu.memory_space<vmem>>, vector<128x128xf32>
    %cst = arith.constant dense<0.000000e+00> : vector<16x128xf32>
    %2 = tpu.matmul %0, %1, %cst {dimension_numbers = #tpu.dot_dimension_numbers<[1], [0], [0], [1], [0, 0, 1, 1], [], []>} : vector<16x128xf32>, vector<128x128xf32>, vector<16x128xf32> -> vector<16x128xf32>
    %c0_3 = arith.constant 0 : index
    %c0_4 = arith.constant 0 : index
    %3 = vector.load %arg4[%c0_3, %c0_4] : memref<1x128xf32, #tpu.memory_space<vmem>>, vector<1x128xf32>
    %4 = vector.broadcast %3 : vector<1x128xf32> to vector<16x128xf32>
    %5 = arith.addf %2, %4 : vector<16x128xf32>
    %cst_5 = arith.constant 0.000000e+00 : f32
    %6 = vector.broadcast %cst_5 : f32 to vector<16x128xf32>
    %7 = arith.maximumf %5, %6 : vector<16x128xf32>
    %c0_6 = arith.constant 0 : index
    %c0_7 = arith.constant 0 : index
    %8 = vector.load %arg5[%c0_6, %c0_7] : memref<128x128xf32, #tpu.memory_space<vmem>>, vector<128x128xf32>
    %cst_8 = arith.constant dense<0.000000e+00> : vector<16x128xf32>
    %9 = tpu.matmul %7, %8, %cst_8 {dimension_numbers = #tpu.dot_dimension_numbers<[1], [0], [0], [1], [0, 0, 1, 1], [], []>} : vector<16x128xf32>, vector<128x128xf32>, vector<16x128xf32> -> vector<16x128xf32>
    %c0_i32 = arith.constant 0 : i32
    %10 = arith.cmpi eq, %arg1, %c0_i32 : i32
    %11 = arith.extui %10 : i1 to i32
    %c0_i32_9 = arith.constant 0 : i32
    %12 = arith.cmpi ne, %11, %c0_i32_9 : i32
    scf.if %12 {
      %c0_14 = arith.constant 0 : index
      %c0_15 = arith.constant 0 : index
      %19 = vector.load %arg7[%c0_14, %c0_15] : memref<16x128xf32, #tpu.memory_space<vmem>>, vector<16x128xf32>
      tpu.vector_store %arg7[%c0_14, %c0_15], %9 {strides = array<i32>} : memref<16x128xf32, #tpu.memory_space<vmem>>, vector<16x128xf32>,
    } else {
    }
    %c0_i32_10 = arith.constant 0 : i32
    %13 = arith.cmpi ne, %arg1, %c0_i32_10 : i32
    %14 = arith.extui %13 : i1 to i32
    %c0_i32_11 = arith.constant 0 : i32
    %15 = arith.cmpi ne, %14, %c0_i32_11 : i32
    scf.if %15 {
      %c0_14 = arith.constant 0 : index
      %c0_15 = arith.constant 0 : index
      %19 = vector.load %arg7[%c0_14, %c0_15] : memref<16x128xf32, #tpu.memory_space<vmem>>, vector<16x128xf32>
      %20 = arith.addf %19, %9 : vector<16x128xf32>
      %c0_16 = arith.constant 0 : index
      %c0_17 = arith.constant 0 : index
      %21 = vector.load %arg7[%c0_16, %c0_17] : memref<16x128xf32, #tpu.memory_space<vmem>>, vector<16x128xf32>
      tpu.vector_store %arg7[%c0_16, %c0_17], %20 {strides = array<i32>} : memref<16x128xf32, #tpu.memory_space<vmem>>, vector<16x128xf32>,
    } else {
    }
    %c0_i32_12 = arith.constant 0 : i32
    %16 = arith.cmpi eq, %arg1, %c0_i32_12 : i32
    %17 = arith.extui %16 : i1 to i32
    %c0_i32_13 = arith.constant 0 : i32
    %18 = arith.cmpi ne, %17, %c0_i32_13 : i32
    scf.if %18 {
      %c0_14 = arith.constant 0 : index
      %c0_15 = arith.constant 0 : index
      %19 = vector.load %arg7[%c0_14, %c0_15] : memref<16x128xf32, #tpu.memory_space<vmem>>, vector<16x128xf32>
      %c0_16 = arith.constant 0 : index
      %c0_17 = arith.constant 0 : index
      %20 = vector.load %arg6[%c0_16, %c0_17] : memref<1x128xf32, #tpu.memory_space<vmem>>, vector<1x128xf32>
      %21 = vector.broadcast %20 : vector<1x128xf32> to vector<16x128xf32>
      %22 = arith.addf %19, %21 : vector<16x128xf32>
      %c0_18 = arith.constant 0 : index
      %c0_19 = arith.constant 0 : index
      %23 = vector.load %arg7[%c0_18, %c0_19] : memref<16x128xf32, #tpu.memory_space<vmem>>, vector<16x128xf32>
      tpu.vector_store %arg7[%c0_18, %c0_19], %22 {strides = array<i32>} : memref<16x128xf32, #tpu.memory_space<vmem>>, vector<16x128xf32>,
    } else {
    }
    return
  }
  func.func @transform_0(%arg0: i32, %arg1: i32) -> (i32, i32) {
    %c0_i32 = arith.constant 0 : i32
    %c0_i32_0 = arith.constant 0 : i32
    return %arg0, %c0_i32 : i32, i32
  }
  func.func @transform_1(%arg0: i32, %arg1: i32) -> (i32, i32) {
    %c0_i32 = arith.constant 0 : i32
    %c0_i32_0 = arith.constant 0 : i32
    return %c0_i32, %arg1 : i32, i32
  }
  func.func @transform_2(%arg0: i32, %arg1: i32) -> (i32, i32) {
    %c0_i32 = arith.constant 0 : i32
    %c0_i32_0 = arith.constant 0 : i32
    return %c0_i32, %arg1 : i32, i32
  }
  func.func @transform_3(%arg0: i32, %arg1: i32) -> (i32, i32) {
    %c0_i32 = arith.constant 0 : i32
    %c0_i32_0 = arith.constant 0 : i32
    return %arg1, %c0_i32 : i32, i32
  }
  func.func @transform_4(%arg0: i32, %arg1: i32) -> (i32, i32) {
    %c0_i32 = arith.constant 0 : i32
    %c0_i32_0 = arith.constant 0 : i32
    %c0_i32_1 = arith.constant 0 : i32
    return %c0_i32, %c0_i32_0 : i32, i32
  }
  func.func @transform_5(%arg0: i32, %arg1: i32) -> (i32, i32) {
    %c0_i32 = arith.constant 0 : i32
    %c0_i32_0 = arith.constant 0 : i32
    return %arg0, %c0_i32 : i32, i32
  }
}

</mosaic_0001>

<bundles_post_ra>
// kernel: _ffn_forward.1
= control target key start
LH: loop header
LB: loop body
LE: loop exit
PB: predicated region body
PF: predicated region fallthrough
CT: control target
= control target key end

     0   :  { %10 = vsyncpa [#allocation3], 0  ;;  %s778_s0 = inlined_call_operand.hbm [shape: f32[16,128], index: 0, kind: input, shape index: {}]   ;;  %s779_s1 = inlined_call_operand.hbm [shape: f32[128,128], index: 1, kind: input, shape index: {}]   ;;  %s780_s2 = inlined_call_operand.hbm [shape: f32[1,128], index: 2, kind: input, shape index: {}]   ;;  %s781_s3 = inlined_call_operand.hbm [shape: f32[128,128], index: 3, kind: input, shape index: {}]   ;;  %s782_s4 = inlined_call_operand.hbm [shape: f32[1,128], index: 4, kind: input, shape index: {}]   ;;  %s783_s5 = inlined_call_operand.hbm [shape: f32[16,128], index: 5, kind: output, shape index: {}]  }
   0x1   :  { %11 = vsyncpa [#allocation6], 0 }
   0x2   :  { %12 = vsyncpa [#allocation9], 0 }
   0x3   :  { %13 = vsyncpa [#allocation4], 0  ;;  %s649_s18 = smov [#allocation5]   ;;  %s650_s20 = smov [#allocation8]  }
   0x4   :  { %s31_s19 = sshll.u32 %s649_s18, 4  ;;  %s53_s21 = sshll.u32 %s650_s20, 4  ;;  %s32_s19 = int_to_ptr.vmem [resolvable:$true] %s31_s19  ;;  %s687_s21 = int_to_ptr.vmem [resolvable:$true] %s53_s21 }
   0x5   :  { %s509_s24 = scalar_lea.hbm %s779_s1, 2048 }
   0x6   :  { %p510_p0 = scmp.ne.s32.totalorder %s779_s1, %s509_s24  ;;  %p513_p1 = scmp.lt.u32.totalorder %s509_s24, %s779_s1 }
   0x8   :  { %p515_p2 = pnand %p513_p1, %p510_p0 }
   0xa   :  { %518 = shalt.err (!%p515_p2)
}
   0xb   :  { %s519_s29 = scalar_lea.vmem %s32_s19, 2048  ;;  %p524_p4 = scmp.lt.s32.totalorder %s32_s19, %s32_s19 }
   0xc   :  { %p520_p3 = scmp.ne.s32.totalorder %s32_s19, %s519_s29  ;;  %p525_p5 = scmp.lt.s32.totalorder %s519_s29, %s519_s29 }
   0xe   :  { %p526_p6 = por %p525_p5, %p524_p4 }
  0x10   :  { %p527_p7 = pnand %p526_p6, %p520_p3 }
  0x12   :  { %530 = shalt.err (!%p527_p7)
}
  0x13   :  { %s651_s30 = smov 128   ;;  %s652_s6 = smov 8  }
  0x14   :  { %37 = dma.hbm_to_vmem [thread:$0]  %s779_s1, 2048, %s32_s19, [#allocation6], %s651_s30, %s651_s30, %s652_s6  }
  0x15   :  { %s531_s11 = scalar_lea.hbm %s781_s3, 2048 }
  0x16   :  { %p532_p8 = scmp.ne.s32.totalorder %s781_s3, %s531_s11  ;;  %p535_p9 = scmp.lt.u32.totalorder %s531_s11, %s781_s3 }
  0x18   :  { %p537_p10 = pnand %p535_p9, %p532_p8 }
  0x1a   :  { %540 = shalt.err (!%p537_p10)
}
  0x1b   :  { %s541_s16 = scalar_lea.vmem %s687_s21, 2048  ;;  %p546_p12 = scmp.lt.s32.totalorder %s687_s21, %s687_s21 }
  0x1c   :  { %p542_p11 = scmp.ne.s32.totalorder %s687_s21, %s541_s16  ;;  %p547_p13 = scmp.lt.s32.totalorder %s541_s16, %s541_s16 }
  0x1e   :  { %p548_p0 = por %p547_p13, %p546_p12 }
  0x20   :  { %p549_p1 = pnand %p548_p0, %p542_p11 }
  0x22   :  { %552 = shalt.err (!%p549_p1)
}
  0x23   :  { %59 = dma.hbm_to_vmem [thread:$0]  %s781_s3, 2048, %s687_s21, [#allocation9], %s651_s30, %s651_s30, %s652_s6  }
  0x24   :  { %s653_s18 = smov [#allocation2]   ;;  %s654_s20 = smov [#allocation7]  }
  0x25   :  { %s19_s19 = sshll.u32 %s653_s18, 4  ;;  %s44_s22 = sshll.u32 %s654_s20, 4  ;;  %s20_s19 = int_to_ptr.vmem [resolvable:$true] %s19_s19  ;;  %s45_s22 = int_to_ptr.vmem [resolvable:$true] %s44_s22 }
  0x26   :  { %s553_s25 = scalar_lea.hbm %s778_s0, 256 }
  0x27   :  { %p554_p2 = scmp.ne.s32.totalorder %s778_s0, %s553_s25  ;;  %p557_p3 = scmp.lt.u32.totalorder %s553_s25, %s778_s0 }
  0x29   :  { %p559_p4 = pnand %p557_p3, %p554_p2 }
  0x2b   :  { %562 = shalt.err (!%p559_p4)
}
  0x2c   :  { %s563_s3 = scalar_lea.vmem %s20_s19, 256  ;;  %p568_p6 = scmp.lt.s32.totalorder %s20_s19, %s20_s19 }
  0x2d   :  { %p564_p5 = scmp.ne.s32.totalorder %s20_s19, %s563_s3  ;;  %p569_p7 = scmp.lt.s32.totalorder %s563_s3, %s563_s3 }
  0x2f   :  { %p570_p8 = por %p569_p7, %p568_p6 }
  0x31   :  { %p571_p9 = pnand %p570_p8, %p564_p5 }
  0x33   :  { %574 = shalt.err (!%p571_p9)
}
  0x34   :  { %25 = dma.hbm_to_vmem [thread:$0]  %s778_s0, 256, %s20_s19, [#allocation3], %s651_s30, %s651_s30, %s652_s6  }
  0x35   :  { %s575_s10 = scalar_lea.hbm %s780_s2, 16 }
  0x36   :  { %p576_p10 = scmp.ne.s32.totalorder %s780_s2, %s575_s10  ;;  %p579_p11 = scmp.lt.u32.totalorder %s575_s10, %s780_s2 }
  0x38   :  { %p581_p12 = pnand %p579_p11, %p576_p10 }
  0x3a   :  { %584 = shalt.err (!%p581_p12)
}
  0x3b   :  { %s585_s15 = scalar_lea.vmem %s45_s22, 16  ;;  %s589_s16 = scalar_lea.vmem %s45_s22, 32 }
  0x3c   :  { %p586_p13 = scmp.ne.s32.totalorder %s45_s22, %s585_s15  ;;  %p590_p0 = scmp.lt.s32.totalorder %s45_s22, %s45_s22 }
  0x3d   :  { %p591_p1 = scmp.lt.s32.totalorder %s589_s16, %s585_s15 }
  0x3f   :  { %p592_p2 = por %p591_p1, %p590_p0 }
  0x41   :  { %p593_p3 = pnand %p592_p2, %p586_p13 }
  0x43   :  { %596 = shalt.err (!%p593_p3)
}
  0x44   :  { %47 = dma.hbm_to_vmem [thread:$0]  %s780_s2, 16, %s45_s22, [#allocation6]  }
  0x45   :  { %s655_s17 = smov [#allocation10]   ;;  %s597_s23 = scalar_lea.hbm %s782_s4, 16 }
  0x46   :  { %s66_s18 = sshll.u32 %s655_s17, 4  ;;  %p598_p4 = scmp.ne.s32.totalorder %s782_s4, %s597_s23  ;;  %s67_s18 = int_to_ptr.vmem [resolvable:$true] %s66_s18 }
  0x47   :  { %p601_p5 = scmp.lt.u32.totalorder %s597_s23, %s782_s4 }
  0x49   :  { %p603_p6 = pnand %p601_p5, %p598_p4 }
  0x4b   :  { %606 = shalt.err (!%p603_p6)
}
  0x4c   :  { %s607_s28 = scalar_lea.vmem %s67_s18, 16  ;;  %s611_s2 = scalar_lea.vmem %s67_s18, 32 }
  0x4d   :  { %p608_p7 = scmp.ne.s32.totalorder %s67_s18, %s607_s28  ;;  %p612_p8 = scmp.lt.s32.totalorder %s67_s18, %s67_s18 }
  0x4e   :  { %p613_p9 = scmp.lt.s32.totalorder %s611_s2, %s607_s28 }
  0x50   :  { %p614_p10 = por %p613_p9, %p612_p8 }
  0x52   :  { %p615_p11 = pnand %p614_p10, %p608_p7 }
  0x54   :  { %618 = shalt.err (!%p615_p11)
}
  0x55   :  { %69 = dma.hbm_to_vmem [thread:$0]  %s782_s4, 16, %s67_s18, [#allocation9]  }
  0x56   :  { %641 = dma.done.wait [#allocation3], 256  }
  0x57   :  { %642 = vsyncadd [#allocation3], 4294967040 }
  0x58   :  { %643 = dma.done.wait [#allocation6], 2064  }
  0x59   :  { %644 = vsyncadd [#allocation6], 4294965232 }
  0x5a   :  { %645 = dma.done.wait [#allocation9], 2064  }
  0x5b   :  { %646 = vsyncadd [#allocation9], 4294965232  ;;  %v87_v0 = vld [vmem:[#allocation5] sm:$0xff]  ;;  %v88_v1 = vld [vmem:[#allocation5 + $0x8] sm:$0xff]  ;;  %s656_s4 = smov [#allocation11]  }
  0x5c   :  { %v89_v2 = vld [vmem:[#allocation5 + $0x10] sm:$0xff]  ;;  %v437_v3 = vpack.c.bf16 %v88_v1, %v87_v0  ;;  %v90_v4 = vld [vmem:[#allocation5 + $0x18] sm:$0xff]  ;;  %v91_v6 = vld [vmem:[#allocation5 + $0x20] sm:$0xff]  ;;  %s315_s3 = sshll.u32 %s656_s4, 4  ;;  %s316_s3 = int_to_ptr.vmem [resolvable:$true] %s315_s3 }
  0x5d   :  { %v441_v5 = vpack.c.bf16 %v90_v4, %v89_v2  ;;  %v92_v7 = vld [vmem:[#allocation5 + $0x28] sm:$0xff]  ;;  %v93_v9 = vld [vmem:[#allocation5 + $0x30] sm:$0xff]  ;;  %v94_v10 = vld [vmem:[#allocation5 + $0x38] sm:$0xff]  ;;  %s619_s21 = scalar_lea.vmem %s316_s3, 256  ;;  %p624_p13 = scmp.lt.s32.totalorder %s316_s3, %s316_s3 }
  0x5e   :  { %438 = vmatprep.subr.bf16.mxu0 %v437_v3  ;;  %v445_v8 = vpack.c.bf16 %v92_v7, %v91_v6  ;;  %v85_v11 = vld [vmem:[#allocation2] sm:$0xff]  ;;  %v187_v12 = vld [vmem:[#allocation8] sm:$0xff]  ;;  %v190_v16 = vld [vmem:[#allocation8 + $0x18] sm:$0xff]  ;;  %v449_v20 = vpack.c.bf16 %v94_v10, %v93_v9  ;;  %p620_p12 = scmp.ne.s32.totalorder %s316_s3, %s619_s21  ;;  %p625_p0 = scmp.lt.s32.totalorder %s619_s21, %s619_s21 }
  0x5f   :  { %440 = vmatpush3.bf16.msra.mxu0 %v437_v3  ;;  %399 = vmatprep.mubr.f32.mxu0 %v85_v11  ;;  %v188_v13 = vld [vmem:[#allocation8 + $0x8] sm:$0xff]  ;;  %v189_v14 = vld [vmem:[#allocation8 + $0x10] sm:$0xff]  ;;  %v191_v18 = vld [vmem:[#allocation8 + $0x20] sm:$0xff] }
  0x60   :  { %442 = vmatprep.subr.bf16.mxu0 %v441_v5  ;;  %v469_v15 = vpack.c.bf16 %v188_v13, %v187_v12  ;;  %v473_v17 = vpack.c.bf16 %v190_v16, %v189_v14  ;;  %v192_v19 = vld [vmem:[#allocation8 + $0x28] sm:$0xff]  ;;  %v95_v21 = vld [vmem:[#allocation5 + $0x40] sm:$0xff]  ;;  %v193_v24 = vld [vmem:[#allocation8 + $0x30] sm:$0xff]  ;;  %p626_p1 = por %p625_p0, %p624_p13 }
  0x61   :  { %v96_v22 = vld [vmem:[#allocation5 + $0x48] sm:$0xff]  ;;  %v477_v23 = vpack.c.bf16 %v192_v19, %v191_v18  ;;  %v194_v25 = vld [vmem:[#allocation8 + $0x38] sm:$0xff]  ;;  %v97_v27 = vld [vmem:[#allocation5 + $0x50] sm:$0xff] }
  0x62   :  { %470 = vmatprep.subr.bf16.mxu1 %v469_v15  ;;  %v453_v26 = vpack.c.bf16 %v96_v22, %v95_v21  ;;  %v98_v28 = vld [vmem:[#allocation5 + $0x58] sm:$0xff]  ;;  %v481_v29 = vpack.c.bf16 %v194_v25, %v193_v24  ;;  %v195_v30 = vld [vmem:[#allocation8 + $0x40] sm:$0xff]  ;;  %v196_v31 = vld [vmem:[#allocation8 + $0x48] sm:$0xff]  ;;  %p627_p2 = pnand %p626_p1, %p620_p12 }
  0x63   :  { %444 = vmatpush3.bf16.msra.mxu0 %v441_v5  ;;  %472 = vmatpush3.bf16.msra.mxu1 %v469_v15  ;;  %v457_v32 = vpack.c.bf16 %v98_v28, %v97_v27  ;;  %v99_v33 = vld [vmem:[#allocation5 + $0x60] sm:$0xff]  ;;  %v100_v34 = vld [vmem:[#allocation5 + $0x68] sm:$0xff]  ;;  %v485_v35 = vpack.c.bf16 %v196_v31, %v195_v30  ;;  %v197_v36 = vld [vmem:[#allocation8 + $0x50] sm:$0xff] }
  0x64   :  { %446 = vmatprep.subr.bf16.mxu0 %v445_v8  ;;  %474 = vmatprep.subr.bf16.mxu1 %v473_v17  ;;  %v198_v37 = vld [vmem:[#allocation8 + $0x58] sm:$0xff]  ;;  %v461_v38 = vpack.c.bf16 %v100_v34, %v99_v33  ;;  %v101_v39 = vld [vmem:[#allocation5 + $0x70] sm:$0xff]  ;;  %v199_v42 = vld [vmem:[#allocation8 + $0x60] sm:$0xff] }
  0x65   :  { %v102_v40 = vld [vmem:[#allocation5 + $0x78] sm:$0xff]  ;;  %v489_v41 = vpack.c.bf16 %v198_v37, %v197_v36  ;;  %v200_v43 = vld [vmem:[#allocation8 + $0x68] sm:$0xff]  ;;  %v329_v50 = vld [vmem:[#allocation7] ss:$0 sm:$0xff] }
  0x66   :  { %v465_v44 = vpack.c.bf16 %v102_v40, %v101_v39  ;;  %v493_v45 = vpack.c.bf16 %v200_v43, %v199_v42  ;;  %v86_v46 = vld [vmem:[#allocation2 + $0x8] sm:$0xff]  ;;  %v330_v57 = vld [vmem:[#allocation10] ss:$0 sm:$0xff] }
  0x67   :  { %448 = vmatpush3.bf16.msra.mxu0 %v445_v8  ;;  %476 = vmatpush3.bf16.msra.mxu1 %v473_v17  ;;  %v201_v47 = vld [vmem:[#allocation8 + $0x70] sm:$0xff]  ;;  %v202_v48 = vld [vmem:[#allocation8 + $0x78] sm:$0xff] }
  0x68   :  { %450 = vmatprep.subr.bf16.mxu0 %v449_v20  ;;  %478 = vmatprep.subr.bf16.mxu1 %v477_v23  ;;  %v497_v49 = vpack.c.bf16 %v202_v48, %v201_v47 }
  0x6b   :  { %452 = vmatpush3.bf16.msra.mxu0 %v449_v20  ;;  %480 = vmatpush3.bf16.msra.mxu1 %v477_v23 }
  0x6c   :  { %454 = vmatprep.subr.bf16.mxu0 %v453_v26  ;;  %482 = vmatprep.subr.bf16.mxu1 %v481_v29 }
  0x6f   :  { %456 = vmatpush3.bf16.msra.mxu0 %v453_v26  ;;  %484 = vmatpush3.bf16.msra.mxu1 %v481_v29 }
  0x70   :  { %458 = vmatprep.subr.bf16.mxu0 %v457_v32  ;;  %486 = vmatprep.subr.bf16.mxu1 %v485_v35 }
  0x73   :  { %460 = vmatpush3.bf16.msra.mxu0 %v457_v32  ;;  %488 = vmatpush3.bf16.msra.mxu1 %v485_v35 }
  0x74   :  { %462 = vmatprep.subr.bf16.mxu0 %v461_v38  ;;  %490 = vmatprep.subr.bf16.mxu1 %v489_v41 }
  0x77   :  { %464 = vmatpush3.bf16.msra.mxu0 %v461_v38  ;;  %492 = vmatpush3.bf16.msra.mxu1 %v489_v41 }
  0x78   :  { %466 = vmatprep.subr.bf16.mxu0 %v465_v44  ;;  %494 = vmatprep.subr.bf16.mxu1 %v493_v45 }
  0x7b   :  { %468 = vmatpush3.bf16.msra.mxu0 %v465_v44  ;;  %496 = vmatpush3.bf16.msra.mxu1 %v493_v45 }
  0x7c   :  { %498 = vmatprep.subr.bf16.mxu1 %v497_v49 }
  0x7e   :  { %400 = vmatmul.mubr.f32.vlgmr.msra.gmra.mrb[0].mxu0 %v86_v46 }
  0x7f   :  { %500 = vmatpush3.bf16.msra.mxu1 %v497_v49 }
 0x151   :  { %v401_v51 = vpop.f32.mrb[0].mxu0 }
 0x152   :  { %v182_v52 = vadd.f32 %v401_v51, %v329_v50  ;;  %v176_v53 = vpop.f32.mrb[1].mxu0 }
 0x153   :  { %v177_v54 = vadd.f32 %v329_v50, %v176_v53 }
 0x154   :  { %v186_v56 = vmax.f32 %v182_v52, 0.0 }
 0x155   :  { %v185_v55 = vmax.f32 %v177_v54, 0.0 }
 0x157   :  { %434 = vmatprep.mubr.f32.mxu1 %v185_v55 }
 0x158   :  { %435 = vmatmul.mubr.f32.vlgmr.msra.gmra.mrb[0].mxu1 %v186_v56 }
 0x22b   :  { %v436_v58 = vpop.f32.mrb[0].mxu1 }
 0x22c   :  { %v269_v59 = vpop.f32.mrb[1].mxu1  ;;  %v307_v60 = vadd.f32 %v436_v58, %v330_v57 }
 0x22d   :  { %v306_v61 = vadd.f32 %v330_v57, %v269_v59 }
 0x22e   :  { %309 = vst [vmem:[#allocation11 + $0x8] sm:$0xff] %v307_v60 }
 0x22f   :  { %308 = vst [vmem:[#allocation11] sm:$0xff] %v306_v61 }
 0x230   :  { %630 = shalt.err (!%p627_p2)
}
 0x231   :  { %s631_s9 = scalar_lea.hbm %s783_s5, 256 }
 0x232   :  { %p632_p3 = scmp.ne.s32.totalorder %s783_s5, %s631_s9  ;;  %p635_p4 = scmp.lt.u32.totalorder %s631_s9, %s783_s5 }
 0x234   :  { %p637_p5 = pnand %p635_p4, %p632_p3 }
 0x236   :  { %640 = shalt.err (!%p637_p5)
}
 0x237   :  { %321 = dma.vmem_to_hbm [thread:$0]  %s316_s3, 256, %s783_s5, [#allocation4], %s651_s30, %s651_s30, %s652_s6  }
 0x238   :  { %647 = dma.done.wait [#allocation4], 256  }
 0x239   :  { %648 = vsyncadd [#allocation4], 4294967040 }
 0x23a   :  { %325 = vsyncpa [#allocation3], 1 }
 0x23b   :  { %326 = vsyncpa [#allocation6], 1 }
 0x23c   :  { %327 = vsyncpa [#allocation9], 1 }
 0x23d   :  { %328 = vsyncpa [#allocation4], 1 }

</bundles_post_ra>
